<compile_context>
chip_gen: v7x
topology: tpu7x:2x2x1
jax: 0.10.0
libtpu: 0.0.40
codegen_flags: <defaults>
</compile_context>

<pallas_src>
import math
from functools import partial

import jax
import jax.numpy as jnp
from jax import lax
from jax.experimental import pallas as pl
from jax.experimental.pallas import tpu as pltpu


def _round_up(x, m):
    return ((x + m - 1) // m) * m


def _pad_seq(S):
    # Pad to a multiple of 128 when the sequence is large enough to tile;
    # otherwise pad to a multiple of 16 (covers bf16 sublane tiling) and use a
    # single full-extent block.
    return _round_up(S, 128) if S >= 128 else _round_up(S, 16)


def _seq_tile(S_pad, candidates):
    for t in candidates:
        if S_pad >= t and S_pad % t == 0:
            return t
    return S_pad


# ---------------------------------------------------------------------------
# Kernel 1: fused Q/K/V projections, head-major output
# ---------------------------------------------------------------------------
def _qkv_proj_kernel(*refs, h, d_k, n_inputs):
    # refs layout:
    #   self-attention : (x, w_qkv, b_qkv, q_out, k_out, v_out)
    #   cross-attention: (xq, xk, xv, w_qkv, b_qkv, q_out, k_out, v_out)
    if n_inputs == 1:
        x_ref, w_ref, b_ref, q_out, k_out, v_out = refs
        x = x_ref[0]                           # (TS, D), single DMA / read
        xs = (x, x, x)
    else:
        xq_ref, xk_ref, xv_ref, w_ref, b_ref, q_out, k_out, v_out = refs
        xs = (xq_ref[0], xk_ref[0], xv_ref[0])
    outs = (q_out, k_out, v_out)

    for idx in range(3):
        y = jnp.dot(xs[idx], w_ref[idx],
                    preferred_element_type=jnp.float32) + b_ref[idx]
        y = y.astype(outs[idx].dtype)          # (TS, D)
        # Head-major write: the (TS, D) -> (h, TS, d_k) relayout happens ONCE
        # here, not per KV step inside the attention kernel.
        # TODO(synk): pack 2 heads per 128-lane block when d_k < 128 for
        # fully lane-dense stores.
        for hh in range(h):
            outs[idx][0, hh] = y[:, hh * d_k:(hh + 1) * d_k]


def _qkv_projection(acts, w_qkv, b_qkv, h, d_k, out_dtype):
    """acts: tuple of 1 (self-attention) or 3 (cross-attention) padded inputs."""
    B, S_pad, D = acts[0].shape
    TS = _seq_tile(S_pad, (512, 256, 128))
    n_inputs = len(acts)

    act_spec = pl.BlockSpec((1, TS, D), lambda b, s: (b, s, 0))
    w_spec = pl.BlockSpec((3, D, D), lambda b, s: (0, 0, 0))
    b_spec = pl.BlockSpec((3, 1, D), lambda b, s: (0, 0, 0))
    head_spec = pl.BlockSpec((1, h, TS, d_k), lambda b, s: (b, 0, s, 0))
    out_sds = jax.ShapeDtypeStruct((B, h, S_pad, d_k), out_dtype)

    itemsize = jnp.dtype(out_dtype).itemsize
    flops = 2 * 3 * B * S_pad * D * D
    bytes_accessed = int((n_inputs * B * S_pad * D + 3 * D * D + 3 * D
                          + 3 * B * S_pad * D) * itemsize)

    kernel = partial(_qkv_proj_kernel, h=h, d_k=d_k, n_inputs=n_inputs)
    return pl.pallas_call(
        kernel,
        out_shape=(out_sds, out_sds, out_sds),
        grid=(B, S_pad // TS),
        in_specs=[act_spec] * n_inputs + [w_spec, b_spec],
        out_specs=(head_spec, head_spec, head_spec),
        compiler_params=pltpu.CompilerParams(
            dimension_semantics=("parallel", "parallel")),
        cost_estimate=pl.CostEstimate(flops=flops, transcendentals=0,
                                      bytes_accessed=bytes_accessed),
    )(*acts, w_qkv, b_qkv)


# ---------------------------------------------------------------------------
# Kernel 2: flash attention (online softmax) + fused per-head output projection
# ---------------------------------------------------------------------------
def _flash_mha_kernel(q_ref, k_ref, v_ref, wo_ref, bo_ref, out_ref,
                      m_scr, l_scr, acc_scr, o_scr,
                      *, s_valid, s_pad, exp_bf16):
    hh = pl.program_id(2)
    ki = pl.program_id(3)
    nh = pl.num_programs(2)
    nk = pl.num_programs(3)

    @pl.when((hh == 0) & (ki == 0))
    def _init_out():
        o_scr[...] = jnp.zeros(o_scr.shape, jnp.float32)

    @pl.when(ki == 0)
    def _init_head():
        m_scr[...] = jnp.full(m_scr.shape, -jnp.inf, jnp.float32)
        l_scr[...] = jnp.zeros(l_scr.shape, jnp.float32)
        acc_scr[...] = jnp.zeros(acc_scr.shape, jnp.float32)

    q2 = q_ref[0, 0]                       # (TQ, d_k); 1/sqrt(d_k) in W_q
    k2 = k_ref[0, 0]                       # (TK, d_k)
    v2 = v_ref[0, 0]                       # (TK, d_k)
    tk = k2.shape[0]

    # Scores: contract on d_k (no explicit K transpose), f32 accumulation.
    s = lax.dot_general(q2, k2, (((1,), (1,)), ((), ())),
                        preferred_element_type=jnp.float32)   # (TQ, TK)

    if s_valid < s_pad:
        # Mask padded key positions (same fill value as torch masked_fill).
        col = ki * tk + lax.broadcasted_iota(jnp.int32, s.shape, 1)
        s = jnp.where(col < s_valid, s, -1e9)

    # Online (flash) softmax update across KV blocks.
    m_prev = m_scr[...]
    m_new = jnp.maximum(m_prev, jnp.max(s, axis=-1, keepdims=True))
    alpha = jnp.exp(m_prev - m_new)
    x = s - m_new
    if exp_bf16:
        # bf16 exponent ~doubles EUP throughput on v6e/v7x; m/l stay in f32.
        p = jnp.exp(x.astype(jnp.bfloat16))
    else:
        p = jnp.exp(x)
    l_scr[...] = alpha * l_scr[...] + jnp.sum(p.astype(jnp.float32),
                                              axis=-1, keepdims=True)
    acc_scr[...] = alpha * acc_scr[...] + jnp.dot(
        p.astype(v2.dtype), v2, preferred_element_type=jnp.float32)
    m_scr[...] = m_new

    # Fused output projection as per-head partial sums:
    #   out = b_o + sum_h ctx_h @ W_o[h*d_k:(h+1)*d_k, :]
    @pl.when(ki == nk - 1)
    def _finalize_head():
        inv_l = pl.reciprocal(l_scr[...], approx=True)         # EUP, not VALU
        ctx = (acc_scr[...] * inv_l).astype(wo_ref.dtype)      # (TQ, d_k)
        o_scr[...] += jnp.dot(ctx, wo_ref[0],
                              preferred_element_type=jnp.float32)

    @pl.when((ki == nk - 1) & (hh == nh - 1))
    def _write_out():
        out_ref[0] = (o_scr[...] + bo_ref[...]).astype(out_ref.dtype)


def multi_headed_attention(xq, xk, xv, params, h, *, compute_dtype=None):
    """Forward of MultiHeadedAttention (eval mode, mask=None).

    params = (wq, bq, wk, bk, wv, bv, wo, bo); weights [D, D] (d_in, d_out),
    biases [D]. compute_dtype=jnp.bfloat16 enables the low-precision fast path.
    """
    B, S, D = xq.shape
    assert D % h == 0
    d_k = D // h
    wq, bq, wk, bk, wv, bv, wo, bo = params
    cdt = jnp.dtype(compute_dtype) if compute_dtype is not None else jnp.dtype(xq.dtype)

    # Fold the 1/sqrt(d_k) softmax scale into the Q projection (zero kernel cost).
    scale = 1.0 / math.sqrt(d_k)
    w_qkv = jnp.stack([wq.astype(jnp.float32) * scale,
                       wk.astype(jnp.float32),
                       wv.astype(jnp.float32)]).astype(cdt)            # (3, D, D)
    b_qkv = jnp.stack([bq.astype(jnp.float32) * scale,
                       bk.astype(jnp.float32),
                       bv.astype(jnp.float32)]).reshape(3, 1, D).astype(cdt)
    wo_h = wo.astype(cdt).reshape(h, d_k, D)   # per-head rows of W_o (free reshape)
    bo_r = bo.astype(cdt).reshape(1, D)

    # Pad the sequence so every block is (8,128)-friendly; padded keys are
    # masked in-kernel, padded query rows are sliced off below.
    S_pad = _pad_seq(S)

    def prep(x):
        x = x.astype(cdt)
        if S_pad != S:
            x = jnp.pad(x, ((0, 0), (0, S_pad - S), (0, 0)))
        return x

    self_attn = (xq is xk) and (xk is xv)
    acts = (prep(xq),) if self_attn else (prep(xq), prep(xk), prep(xv))

    # Head-major Q/K/V: (B, h, S_pad, d_k).
    q, k, v = _qkv_projection(acts, w_qkv, b_qkv, h, d_k, cdt)

    TQ = _seq_tile(S_pad, (256, 128))
    TK = _seq_tile(S_pad, (128,))

    q_spec = pl.BlockSpec((1, 1, TQ, d_k), lambda b, qi, hh, ki: (b, hh, qi, 0))
    kv_spec = pl.BlockSpec((1, 1, TK, d_k), lambda b, qi, hh, ki: (b, hh, ki, 0))
    wo_spec = pl.BlockSpec((1, d_k, D), lambda b, qi, hh, ki: (hh, 0, 0))
    bo_spec = pl.BlockSpec((1, D), lambda b, qi, hh, ki: (0, 0))
    out_spec = pl.BlockSpec((1, TQ, D), lambda b, qi, hh, ki: (b, qi, 0))

    exp_bf16 = (cdt == jnp.dtype(jnp.bfloat16))
    kernel = partial(_flash_mha_kernel, s_valid=S, s_pad=S_pad, exp_bf16=exp_bf16)

    itemsize = cdt.itemsize
    nq = S_pad // TQ
    flops = 4 * B * h * S_pad * S_pad * d_k + 2 * B * S_pad * D * D
    transcendentals = B * h * S_pad * S_pad
    bytes_accessed = int(
        (B * h * S_pad * d_k                       # Q, read once
         + 2 * B * h * S_pad * d_k * nq            # K, V re-read per Q tile
         + B * nq * h * d_k * D + D                # W_o per (q-tile, head), b_o
         + B * S_pad * D) * itemsize)              # output

    out = pl.pallas_call(
        kernel,
        out_shape=jax.ShapeDtypeStruct((B, S_pad, D), cdt),
        grid=(B, S_pad // TQ, h, S_pad // TK),
        in_specs=[q_spec, kv_spec, kv_spec, wo_spec, bo_spec],
        out_specs=out_spec,
        scratch_shapes=[
            pltpu.VMEM((TQ, 1), jnp.float32),      # running max m
            pltpu.VMEM((TQ, 1), jnp.float32),      # running denom l
            pltpu.VMEM((TQ, d_k), jnp.float32),    # per-head context accumulator
            pltpu.VMEM((TQ, D), jnp.float32),      # fused output-proj accumulator
        ],
        compiler_params=pltpu.CompilerParams(
            dimension_semantics=("parallel", "parallel",
                                 "arbitrary", "arbitrary")),
        cost_estimate=pl.CostEstimate(flops=flops,
                                      transcendentals=transcendentals,
                                      bytes_accessed=bytes_accessed),
    )(q, k, v, wo_h, bo_r)

    return out[:, :S, :] if S_pad != S else out


# ---------------------------------------------------------------------------
# Pure-JAX reference (PyTorch forward semantics, dropout in eval mode)
# ---------------------------------------------------------------------------
def _reference(xq, xk, xv, params, h):
    B, S, D = xq.shape
    d_k = D // h
    wq, bq, wk, bk, wv, bv, wo, bo = params

    def proj(x, w, b):
        y = x @ w + b
        return y.reshape(B, S, h, d_k).transpose(0, 2, 1, 3)   # (B, h, S, d_k)

    q = proj(xq, wq, bq)
    k = proj(xk, wk, bk)
    v = proj(xv, wv, bv)
    scores = jnp.einsum('bhqd,bhkd->bhqk', q, k) / math.sqrt(d_k)
    p = jax.nn.softmax(scores, axis=-1)
    o = jnp.einsum('bhqk,bhkd->bhqd', p, v)
    o = o.transpose(0, 2, 1, 3).reshape(B, S, D)
    return o @ wo + bo


if __name__ == "__main__":
    B, S, D, H = 2, 8, 32, 4  # batch, seq, d_model, heads

    key = jax.random.PRNGKey(0)
    keys = jax.random.split(key, 12)

    # nn.Linear-style init: uniform(-1/sqrt(fan_in), 1/sqrt(fan_in)), fan_in = D.
    bound = 1.0 / math.sqrt(D)

    def uw(k):
        return jax.random.uniform(k, (D, D), jnp.float32, -bound, bound)

    def ub(k):
        return jax.random.uniform(k, (D,), jnp.float32, -bound, bound)

    params = (uw(keys[0]), ub(keys[1]),   # wq, bq
              uw(keys[2]), ub(keys[3]),   # wk, bk
              uw(keys[4]), ub(keys[5]),   # wv, bv
              uw(keys[6]), ub(keys[7]))   # wo, bo

    xq = jax.random.normal(keys[8], (B, S, D), jnp.float32)
    xk = jax.random.normal(keys[9], (B, S, D), jnp.float32)
    xv = jax.random.normal(keys[10], (B, S, D), jnp.float32)

    # Cross-attention path (distinct q/k/v), f32 compute; also exercises the
    # sequence-padding + key-mask path since S=8 pads to 16.
    out = jax.block_until_ready(multi_headed_attention(xq, xk, xv, params, H))
    ref = _reference(xq, xk, xv, params, H)
    assert out.shape == (B, S, D)
    assert jnp.allclose(out, ref, atol=2e-3, rtol=2e-3), "cross-attn mismatch"

    # Self-attention path (deduplicated activation read in the QKV kernel).
    out_s = jax.block_until_ready(multi_headed_attention(xq, xq, xq, params, H))
    ref_s = _reference(xq, xq, xq, params, H)
    assert jnp.allclose(out_s, ref_s, atol=2e-3, rtol=2e-3), "self-attn mismatch"

    # bf16 compute path: bf16 intermediates, bf16 MXU operands, bf16 exp.
    out_b = jax.block_until_ready(
        multi_headed_attention(xq, xk, xv, params, H,
                               compute_dtype=jnp.bfloat16))
    assert jnp.allclose(out_b.astype(jnp.float32), ref,
                        atol=1e-1, rtol=1e-1), "bf16 mismatch"

    print("KERNEL_OK")
</pallas_src>

<mosaic_0001>
module attributes {stable_mosaic.version = 11 : i64} {
  func.func @_qkv_proj_kernel(%arg0: i32, %arg1: i32, %arg2: memref<1x16x32xf32, #tpu.memory_space<vmem>>, %arg3: memref<1x16x32xf32, #tpu.memory_space<vmem>>, %arg4: memref<1x16x32xf32, #tpu.memory_space<vmem>>, %arg5: memref<3x32x32xf32, #tpu.memory_space<vmem>>, %arg6: memref<3x1x32xf32, #tpu.memory_space<vmem>>, %arg7: memref<1x4x16x8xf32, #tpu.memory_space<vmem>>, %arg8: memref<1x4x16x8xf32, #tpu.memory_space<vmem>>, %arg9: memref<1x4x16x8xf32, #tpu.memory_space<vmem>>) attributes {dimension_semantics = [#tpu.dimension_semantics<parallel>, #tpu.dimension_semantics<parallel>], iteration_bounds = array<i64: 2, 1>, scalar_prefetch = 0 : i64, scratch_operands = 0 : i64, tpu.core_type = #tpu.core_type<tc>, window_params = [{transform_indices = @transform_0, window_bounds = array<i64: 1, 16, 32>}, {transform_indices = @transform_1, window_bounds = array<i64: 1, 16, 32>}, {transform_indices = @transform_2, window_bounds = array<i64: 1, 16, 32>}, {pipeline_mode = #tpu.pipeline_mode<synchronous>, transform_indices = @transform_3, window_bounds = array<i64: 3, 32, 32>}, {pipeline_mode = #tpu.pipeline_mode<synchronous>, transform_indices = @transform_4, window_bounds = array<i64: 3, 1, 32>}, {transform_indices = @transform_5, window_bounds = array<i64: 1, 4, 16, 8>}, {transform_indices = @transform_6, window_bounds = array<i64: 1, 4, 16, 8>}, {transform_indices = @transform_7, window_bounds = array<i64: 1, 4, 16, 8>}]} {
    %c0 = arith.constant 0 : index
    %c0_0 = arith.constant 0 : index
    %c0_1 = arith.constant 0 : index
    %0 = vector.load %arg2[%c0, %c0_0, %c0_1] : memref<1x16x32xf32, #tpu.memory_space<vmem>>, vector<1x16x32xf32>
    %1 = vector.shape_cast %0 : vector<1x16x32xf32> to vector<16x32xf32>
    %c0_2 = arith.constant 0 : index
    %c0_3 = arith.constant 0 : index
    %c0_4 = arith.constant 0 : index
    %2 = vector.load %arg3[%c0_2, %c0_3, %c0_4] : memref<1x16x32xf32, #tpu.memory_space<vmem>>, vector<1x16x32xf32>
    %3 = vector.shape_cast %2 : vector<1x16x32xf32> to vector<16x32xf32>
    %c0_5 = arith.constant 0 : index
    %c0_6 = arith.constant 0 : index
    %c0_7 = arith.constant 0 : index
    %4 = vector.load %arg4[%c0_5, %c0_6, %c0_7] : memref<1x16x32xf32, #tpu.memory_space<vmem>>, vector<1x16x32xf32>
    %5 = vector.shape_cast %4 : vector<1x16x32xf32> to vector<16x32xf32>
    %c0_8 = arith.constant 0 : index
    %c0_9 = arith.constant 0 : index
    %c0_10 = arith.constant 0 : index
    %6 = vector.load %arg5[%c0_8, %c0_9, %c0_10] : memref<3x32x32xf32, #tpu.memory_space<vmem>>, vector<1x32x32xf32>
    %7 = vector.shape_cast %6 : vector<1x32x32xf32> to vector<32x32xf32>
    %cst = arith.constant dense<0.000000e+00> : vector<16x32xf32>
    %8 = tpu.matmul %1, %7, %cst {dimension_numbers = #tpu.dot_dimension_numbers<[1], [0], [0], [1], [0, 0, 1, 1], [], []>} : vector<16x32xf32>, vector<32x32xf32>, vector<16x32xf32> -> vector<16x32xf32>
    %c0_11 = arith.constant 0 : index
    %c0_12 = arith.constant 0 : index
    %c0_13 = arith.constant 0 : index
    %9 = vector.load %arg6[%c0_11, %c0_12, %c0_13] : memref<3x1x32xf32, #tpu.memory_space<vmem>>, vector<1x1x32xf32>
    %10 = vector.shape_cast %9 : vector<1x1x32xf32> to vector<1x32xf32>
    %11 = vector.broadcast %10 : vector<1x32xf32> to vector<16x32xf32>
    %12 = arith.addf %8, %11 : vector<16x32xf32>
    %13 = vector.extract_strided_slice %12 {offsets = [0, 0], sizes = [16, 8], strides = [1, 1]} : vector<16x32xf32> to vector<16x8xf32>
    %c0_14 = arith.constant 0 : index
    %c0_15 = arith.constant 0 : index
    %c0_16 = arith.constant 0 : index
    %c0_17 = arith.constant 0 : index
    %14 = vector.load %arg7[%c0_14, %c0_15, %c0_16, %c0_17] : memref<1x4x16x8xf32, #tpu.memory_space<vmem>>, vector<1x1x16x8xf32>
    %15 = vector.shape_cast %14 : vector<1x1x16x8xf32> to vector<16x8xf32>
    %16 = vector.shape_cast %13 : vector<16x8xf32> to vector<1x1x16x8xf32>
    tpu.vector_store %arg7[%c0_14, %c0_15, %c0_16, %c0_17], %16 {strides = array<i32>} : memref<1x4x16x8xf32, #tpu.memory_space<vmem>>, vector<1x1x16x8xf32>,
    %17 = vector.extract_strided_slice %12 {offsets = [0, 8], sizes = [16, 8], strides = [1, 1]} : vector<16x32xf32> to vector<16x8xf32>
    %c0_18 = arith.constant 0 : index
    %c1 = arith.constant 1 : index
    %c0_19 = arith.constant 0 : index
    %c0_20 = arith.constant 0 : index
    %18 = vector.load %arg7[%c0_18, %c1, %c0_19, %c0_20] : memref<1x4x16x8xf32, #tpu.memory_space<vmem>>, vector<1x1x16x8xf32>
    %19 = vector.shape_cast %18 : vector<1x1x16x8xf32> to vector<16x8xf32>
    %20 = vector.shape_cast %17 : vector<16x8xf32> to vector<1x1x16x8xf32>
    tpu.vector_store %arg7[%c0_18, %c1, %c0_19, %c0_20], %20 {strides = array<i32>} : memref<1x4x16x8xf32, #tpu.memory_space<vmem>>, vector<1x1x16x8xf32>,
    %21 = vector.extract_strided_slice %12 {offsets = [0, 16], sizes = [16, 8], strides = [1, 1]} : vector<16x32xf32> to vector<16x8xf32>
    %c0_21 = arith.constant 0 : index
    %c2 = arith.constant 2 : index
    %c0_22 = arith.constant 0 : index
    %c0_23 = arith.constant 0 : index
    %22 = vector.load %arg7[%c0_21, %c2, %c0_22, %c0_23] : memref<1x4x16x8xf32, #tpu.memory_space<vmem>>, vector<1x1x16x8xf32>
    %23 = vector.shape_cast %22 : vector<1x1x16x8xf32> to vector<16x8xf32>
    %24 = vector.shape_cast %21 : vector<16x8xf32> to vector<1x1x16x8xf32>
    tpu.vector_store %arg7[%c0_21, %c2, %c0_22, %c0_23], %24 {strides = array<i32>} : memref<1x4x16x8xf32, #tpu.memory_space<vmem>>, vector<1x1x16x8xf32>,
    %25 = vector.extract_strided_slice %12 {offsets = [0, 24], sizes = [16, 8], strides = [1, 1]} : vector<16x32xf32> to vector<16x8xf32>
    %c0_24 = arith.constant 0 : index
    %c3 = arith.constant 3 : index
    %c0_25 = arith.constant 0 : index
    %c0_26 = arith.constant 0 : index
    %26 = vector.load %arg7[%c0_24, %c3, %c0_25, %c0_26] : memref<1x4x16x8xf32, #tpu.memory_space<vmem>>, vector<1x1x16x8xf32>
    %27 = vector.shape_cast %26 : vector<1x1x16x8xf32> to vector<16x8xf32>
    %28 = vector.shape_cast %25 : vector<16x8xf32> to vector<1x1x16x8xf32>
    tpu.vector_store %arg7[%c0_24, %c3, %c0_25, %c0_26], %28 {strides = array<i32>} : memref<1x4x16x8xf32, #tpu.memory_space<vmem>>, vector<1x1x16x8xf32>,
    %c1_27 = arith.constant 1 : index
    %c0_28 = arith.constant 0 : index
    %c0_29 = arith.constant 0 : index
    %29 = vector.load %arg5[%c1_27, %c0_28, %c0_29] : memref<3x32x32xf32, #tpu.memory_space<vmem>>, vector<1x32x32xf32>
    %30 = vector.shape_cast %29 : vector<1x32x32xf32> to vector<32x32xf32>
    %cst_30 = arith.constant dense<0.000000e+00> : vector<16x32xf32>
    %31 = tpu.matmul %3, %30, %cst_30 {dimension_numbers = #tpu.dot_dimension_numbers<[1], [0], [0], [1], [0, 0, 1, 1], [], []>} : vector<16x32xf32>, vector<32x32xf32>, vector<16x32xf32> -> vector<16x32xf32>
    %c1_31 = arith.constant 1 : index
    %c0_32 = arith.constant 0 : index
    %c0_33 = arith.constant 0 : index
    %32 = vector.load %arg6[%c1_31, %c0_32, %c0_33] : memref<3x1x32xf32, #tpu.memory_space<vmem>>, vector<1x1x32xf32>
    %33 = vector.shape_cast %32 : vector<1x1x32xf32> to vector<1x32xf32>
    %34 = vector.broadcast %33 : vector<1x32xf32> to vector<16x32xf32>
    %35 = arith.addf %31, %34 : vector<16x32xf32>
    %36 = vector.extract_strided_slice %35 {offsets = [0, 0], sizes = [16, 8], strides = [1, 1]} : vector<16x32xf32> to vector<16x8xf32>
    %c0_34 = arith.constant 0 : index
    %c0_35 = arith.constant 0 : index
    %c0_36 = arith.constant 0 : index
    %c0_37 = arith.constant 0 : index
    %37 = vector.load %arg8[%c0_34, %c0_35, %c0_36, %c0_37] : memref<1x4x16x8xf32, #tpu.memory_space<vmem>>, vector<1x1x16x8xf32>
    %38 = vector.shape_cast %37 : vector<1x1x16x8xf32> to vector<16x8xf32>
    %39 = vector.shape_cast %36 : vector<16x8xf32> to vector<1x1x16x8xf32>
    tpu.vector_store %arg8[%c0_34, %c0_35, %c0_36, %c0_37], %39 {strides = array<i32>} : memref<1x4x16x8xf32, #tpu.memory_space<vmem>>, vector<1x1x16x8xf32>,
    %40 = vector.extract_strided_slice %35 {offsets = [0, 8], sizes = [16, 8], strides = [1, 1]} : vector<16x32xf32> to vector<16x8xf32>
    %c0_38 = arith.constant 0 : index
    %c1_39 = arith.constant 1 : index
    %c0_40 = arith.constant 0 : index
    %c0_41 = arith.constant 0 : index
    %41 = vector.load %arg8[%c0_38, %c1_39, %c0_40, %c0_41] : memref<1x4x16x8xf32, #tpu.memory_space<vmem>>, vector<1x1x16x8xf32>
    %42 = vector.shape_cast %41 : vector<1x1x16x8xf32> to vector<16x8xf32>
    %43 = vector.shape_cast %40 : vector<16x8xf32> to vector<1x1x16x8xf32>
    tpu.vector_store %arg8[%c0_38, %c1_39, %c0_40, %c0_41], %43 {strides = array<i32>} : memref<1x4x16x8xf32, #tpu.memory_space<vmem>>, vector<1x1x16x8xf32>,
    %44 = vector.extract_strided_slice %35 {offsets = [0, 16], sizes = [16, 8], strides = [1, 1]} : vector<16x32xf32> to vector<16x8xf32>
    %c0_42 = arith.constant 0 : index
    %c2_43 = arith.constant 2 : index
    %c0_44 = arith.constant 0 : index
    %c0_45 = arith.constant 0 : index
    %45 = vector.load %arg8[%c0_42, %c2_43, %c0_44, %c0_45] : memref<1x4x16x8xf32, #tpu.memory_space<vmem>>, vector<1x1x16x8xf32>
    %46 = vector.shape_cast %45 : vector<1x1x16x8xf32> to vector<16x8xf32>
    %47 = vector.shape_cast %44 : vector<16x8xf32> to vector<1x1x16x8xf32>
    tpu.vector_store %arg8[%c0_42, %c2_43, %c0_44, %c0_45], %47 {strides = array<i32>} : memref<1x4x16x8xf32, #tpu.memory_space<vmem>>, vector<1x1x16x8xf32>,
    %48 = vector.extract_strided_slice %35 {offsets = [0, 24], sizes = [16, 8], strides = [1, 1]} : vector<16x32xf32> to vector<16x8xf32>
    %c0_46 = arith.constant 0 : index
    %c3_47 = arith.constant 3 : index
    %c0_48 = arith.constant 0 : index
    %c0_49 = arith.constant 0 : index
    %49 = vector.load %arg8[%c0_46, %c3_47, %c0_48, %c0_49] : memref<1x4x16x8xf32, #tpu.memory_space<vmem>>, vector<1x1x16x8xf32>
    %50 = vector.shape_cast %49 : vector<1x1x16x8xf32> to vector<16x8xf32>
    %51 = vector.shape_cast %48 : vector<16x8xf32> to vector<1x1x16x8xf32>
    tpu.vector_store %arg8[%c0_46, %c3_47, %c0_48, %c0_49], %51 {strides = array<i32>} : memref<1x4x16x8xf32, #tpu.memory_space<vmem>>, vector<1x1x16x8xf32>,
    %c2_50 = arith.constant 2 : index
    %c0_51 = arith.constant 0 : index
    %c0_52 = arith.constant 0 : index
    %52 = vector.load %arg5[%c2_50, %c0_51, %c0_52] : memref<3x32x32xf32, #tpu.memory_space<vmem>>, vector<1x32x32xf32>
    %53 = vector.shape_cast %52 : vector<1x32x32xf32> to vector<32x32xf32>
    %cst_53 = arith.constant dense<0.000000e+00> : vector<16x32xf32>
    %54 = tpu.matmul %5, %53, %cst_53 {dimension_numbers = #tpu.dot_dimension_numbers<[1], [0], [0], [1], [0, 0, 1, 1], [], []>} : vector<16x32xf32>, vector<32x32xf32>, vector<16x32xf32> -> vector<16x32xf32>
    %c2_54 = arith.constant 2 : index
    %c0_55 = arith.constant 0 : index
    %c0_56 = arith.constant 0 : index
    %55 = vector.load %arg6[%c2_54, %c0_55, %c0_56] : memref<3x1x32xf32, #tpu.memory_space<vmem>>, vector<1x1x32xf32>
    %56 = vector.shape_cast %55 : vector<1x1x32xf32> to vector<1x32xf32>
    %57 = vector.broadcast %56 : vector<1x32xf32> to vector<16x32xf32>
    %58 = arith.addf %54, %57 : vector<16x32xf32>
    %59 = vector.extract_strided_slice %58 {offsets = [0, 0], sizes = [16, 8], strides = [1, 1]} : vector<16x32xf32> to vector<16x8xf32>
    %c0_57 = arith.constant 0 : index
    %c0_58 = arith.constant 0 : index
    %c0_59 = arith.constant 0 : index
    %c0_60 = arith.constant 0 : index
    %60 = vector.load %arg9[%c0_57, %c0_58, %c0_59, %c0_60] : memref<1x4x16x8xf32, #tpu.memory_space<vmem>>, vector<1x1x16x8xf32>
    %61 = vector.shape_cast %60 : vector<1x1x16x8xf32> to vector<16x8xf32>
    %62 = vector.shape_cast %59 : vector<16x8xf32> to vector<1x1x16x8xf32>
    tpu.vector_store %arg9[%c0_57, %c0_58, %c0_59, %c0_60], %62 {strides = array<i32>} : memref<1x4x16x8xf32, #tpu.memory_space<vmem>>, vector<1x1x16x8xf32>,
    %63 = vector.extract_strided_slice %58 {offsets = [0, 8], sizes = [16, 8], strides = [1, 1]} : vector<16x32xf32> to vector<16x8xf32>
    %c0_61 = arith.constant 0 : index
    %c1_62 = arith.constant 1 : index
    %c0_63 = arith.constant 0 : index
    %c0_64 = arith.constant 0 : index
    %64 = vector.load %arg9[%c0_61, %c1_62, %c0_63, %c0_64] : memref<1x4x16x8xf32, #tpu.memory_space<vmem>>, vector<1x1x16x8xf32>
    %65 = vector.shape_cast %64 : vector<1x1x16x8xf32> to vector<16x8xf32>
    %66 = vector.shape_cast %63 : vector<16x8xf32> to vector<1x1x16x8xf32>
    tpu.vector_store %arg9[%c0_61, %c1_62, %c0_63, %c0_64], %66 {strides = array<i32>} : memref<1x4x16x8xf32, #tpu.memory_space<vmem>>, vector<1x1x16x8xf32>,
    %67 = vector.extract_strided_slice %58 {offsets = [0, 16], sizes = [16, 8], strides = [1, 1]} : vector<16x32xf32> to vector<16x8xf32>
    %c0_65 = arith.constant 0 : index
    %c2_66 = arith.constant 2 : index
    %c0_67 = arith.constant 0 : index
    %c0_68 = arith.constant 0 : index
    %68 = vector.load %arg9[%c0_65, %c2_66, %c0_67, %c0_68] : memref<1x4x16x8xf32, #tpu.memory_space<vmem>>, vector<1x1x16x8xf32>
    %69 = vector.shape_cast %68 : vector<1x1x16x8xf32> to vector<16x8xf32>
    %70 = vector.shape_cast %67 : vector<16x8xf32> to vector<1x1x16x8xf32>
    tpu.vector_store %arg9[%c0_65, %c2_66, %c0_67, %c0_68], %70 {strides = array<i32>} : memref<1x4x16x8xf32, #tpu.memory_space<vmem>>, vector<1x1x16x8xf32>,
    %71 = vector.extract_strided_slice %58 {offsets = [0, 24], sizes = [16, 8], strides = [1, 1]} : vector<16x32xf32> to vector<16x8xf32>
    %c0_69 = arith.constant 0 : index
    %c3_70 = arith.constant 3 : index
    %c0_71 = arith.constant 0 : index
    %c0_72 = arith.constant 0 : index
    %72 = vector.load %arg9[%c0_69, %c3_70, %c0_71, %c0_72] : memref<1x4x16x8xf32, #tpu.memory_space<vmem>>, vector<1x1x16x8xf32>
    %73 = vector.shape_cast %72 : vector<1x1x16x8xf32> to vector<16x8xf32>
    %74 = vector.shape_cast %71 : vector<16x8xf32> to vector<1x1x16x8xf32>
    tpu.vector_store %arg9[%c0_69, %c3_70, %c0_71, %c0_72], %74 {strides = array<i32>} : memref<1x4x16x8xf32, #tpu.memory_space<vmem>>, vector<1x1x16x8xf32>,
    return
  }
  func.func @transform_0(%arg0: i32, %arg1: i32) -> (i32, i32, i32) {
    %c0_i32 = arith.constant 0 : i32
    %c0_i32_0 = arith.constant 0 : i32
    return %arg0, %arg1, %c0_i32 : i32, i32, i32
  }
  func.func @transform_1(%arg0: i32, %arg1: i32) -> (i32, i32, i32) {
    %c0_i32 = arith.constant 0 : i32
    %c0_i32_0 = arith.constant 0 : i32
    return %arg0, %arg1, %c0_i32 : i32, i32, i32
  }
  func.func @transform_2(%arg0: i32, %arg1: i32) -> (i32, i32, i32) {
    %c0_i32 = arith.constant 0 : i32
    %c0_i32_0 = arith.constant 0 : i32
    return %arg0, %arg1, %c0_i32 : i32, i32, i32
  }
  func.func @transform_3(%arg0: i32, %arg1: i32) -> (i32, i32, i32) {
    %c0_i32 = arith.constant 0 : i32
    %c0_i32_0 = arith.constant 0 : i32
    %c0_i32_1 = arith.constant 0 : i32
    %c0_i32_2 = arith.constant 0 : i32
    return %c0_i32, %c0_i32_0, %c0_i32_1 : i32, i32, i32
  }
  func.func @transform_4(%arg0: i32, %arg1: i32) -> (i32, i32, i32) {
    %c0_i32 = arith.constant 0 : i32
    %c0_i32_0 = arith.constant 0 : i32
    %c0_i32_1 = arith.constant 0 : i32
    %c0_i32_2 = arith.constant 0 : i32
    return %c0_i32, %c0_i32_0, %c0_i32_1 : i32, i32, i32
  }
  func.func @transform_5(%arg0: i32, %arg1: i32) -> (i32, i32, i32, i32) {
    %c0_i32 = arith.constant 0 : i32
    %c0_i32_0 = arith.constant 0 : i32
    %c0_i32_1 = arith.constant 0 : i32
    return %arg0, %c0_i32, %arg1, %c0_i32_0 : i32, i32, i32, i32
  }
  func.func @transform_6(%arg0: i32, %arg1: i32) -> (i32, i32, i32, i32) {
    %c0_i32 = arith.constant 0 : i32
    %c0_i32_0 = arith.constant 0 : i32
    %c0_i32_1 = arith.constant 0 : i32
    return %arg0, %c0_i32, %arg1, %c0_i32_0 : i32, i32, i32, i32
  }
  func.func @transform_7(%arg0: i32, %arg1: i32) -> (i32, i32, i32, i32) {
    %c0_i32 = arith.constant 0 : i32
    %c0_i32_0 = arith.constant 0 : i32
    %c0_i32_1 = arith.constant 0 : i32
    return %arg0, %c0_i32, %arg1, %c0_i32_0 : i32, i32, i32, i32
  }
}

</mosaic_0001>

<bundles_post_ra>
// kernel: tpu_custom_call.1
= control target key start
LH: loop header
LB: loop body
LE: loop exit
PB: predicated region body
PF: predicated region fallthrough
CT: control target
= control target key end

     0   :  { %s1912_s0 = inlined_call_operand.hbm [shape: f32[2,16,32], index: 0, kind: input, shape index: {}]   ;;  %s1913_s1 = inlined_call_operand.hbm [shape: f32[2,16,32], index: 1, kind: input, shape index: {}]   ;;  %s1914_s2 = inlined_call_operand.hbm [shape: f32[2,16,32], index: 2, kind: input, shape index: {}]   ;;  %s1915_s3 = inlined_call_operand.hbm [shape: f32[3,32,32], index: 3, kind: input, shape index: {}]   ;;  %s1916_s4 = inlined_call_operand.vmem [shape: f32[3,1,32], index: 4, kind: input, shape index: {}]   ;;  %s1917_s5 = inlined_call_operand.vmem [shape: f32[2,4,16,8], index: 5, kind: output, shape index: {0}]   ;;  %s1918_s6 = inlined_call_operand.vmem [shape: f32[2,4,16,8], index: 6, kind: output, shape index: {1}]   ;;  %s1919_s7 = inlined_call_operand.vmem [shape: f32[2,4,16,8], index: 7, kind: output, shape index: {2}]  }
   0x1   :  { %1936 = sst [smem:[#allocation15_spill]] %s1913_s1 }
   0x2   :  { %1937 = sst [smem:[#allocation16_spill]] %s1918_s6 }
   0x3   :  { %1938 = sst [smem:[#allocation17_spill]] %s1919_s7 }
   0x4   :  { %13 = vsyncpa [#allocation3], 0 }
   0x5   :  { %15 = vsyncpa [#allocation3 + $0x1], 0 }
   0x6   :  { %16 = vsyncpa [#allocation5], 0 }
   0x7   :  { %18 = vsyncpa [#allocation5 + $0x1], 0 }
   0x8   :  { %19 = vsyncpa [#allocation8], 0  ;;  %s1556_s24 = smov 0   ;;  %s1558_s25 = smov 0  }
   0x9   :  { %s1560_s26 = smov 0   ;;  %s1562_s27 = smov 0  }
   0xa   :  { %s1564_s28 = smov 0   ;;  %s1566_s29 = smov 0  }
   0xb LB: > { %1939 = sst [smem:[#allocation12_spill]] %s1501_s28  ;;  %s37_s30 = sadd.s32 1, %s1501_s28  ;;  %s1505_s29 = sphi %s1566_s29, %s25_s29   ;;  %s1501_s28 = sphi %s1564_s28, %s1962_s28   ;;  %s1497_s27 = sphi %s1562_s27, %s1961_s27   ;;  %s1493_s26 = sphi %s1560_s26, %s1965_s26   ;;  %s1489_s25 = sphi %s1558_s25, %s1964_s25   ;;  %s1485_s24 = sphi %s1556_s24, %s1963_s24  }
   0xc   : > { %s46_s8 = sadd.s32 1, %s1493_s26  ;;  %p39_p0 = scmp.ge.s32.totalorder %s37_s30, 2 }
   0xd   : > { %p53_p1 = scmp.ne.s32.totalorder %s1493_s26, %s1489_s25  ;;  %p54_p2 = scmp.eq.s32.totalorder %s1505_s29, 0 }
   0xe   : > { %s1967_s30 = smov (%p39_p0, %s37_s30), 0  ;;  %p1273_p5 = scmp.lt.s32.totalorder %s1505_s29, 2 }
   0xf   : > { %1940 = sst [smem:[#allocation13_spill]] %s1967_s30  ;;  %p55_p3 = por %p54_p2, %p53_p1 }
  0x10   : > { %s41_s9 = ssub.s32 %s1501_s28, %s1967_s30  ;;  %s1921_s10 = sand.u32 1, %s1493_s26  }
  0x11   : > { %p44_p4 = scmp.eq.s32.totalorder %s41_s9, 0  ;;  %s1598_s11 = sshll.u32 %s1501_s28, 8 }
  0x12   : > { %s1605_s13 = sshll.u32 %s1921_s10, 4  ;;  %p1607_p6 = pnand %p1273_p5, %p55_p3 }
  0x13   : > { %s1601_s12 = scalar_select %p44_p4, %s1493_s26, %s46_s8  }
  0x14   : > { %s1942_s14 = scalar_select %p1607_p6, 1, 0 }
  0x15   : > { %1941 = sst [smem:[#allocation14_spill]] %s1601_s12  ;;  %s304_s15 = sand.u32 1, %s1505_s29  }
  0x16   : > { %s1943_s1 = sld [smem:[#allocation15_spill]]  ;;  %s308_s19 = scalar_lea.vmem [#allocation4], %s1605_s13 }
  0x17   : > { %s317_s20 = sshll.u32 %s308_s19, 4  ;;  %s1621_s21 = scalar_lea.sflag [#allocation5], %s304_s15  ;;  %s1619_s20 = int_to_ptr.vmem [resolvable:$true] %s317_s20 }
  0x18   : > { %p1627_p8 = pneg %p1607_p6 }
  0x1a   : > { %s1944_s23 = scalar_select %p1627_p8, 1, 0 }
  0x1c   : > { %s1616_s18 = scalar_lea.hbm %s1943_s1, %s1598_s11  ;;  %s1334_s16 = scalar_lea.hbm %s1943_s1, 512 }
  0x1d   : > { %s1329_s22 = scalar_lea.hbm %s1616_s18, 256  ;;  %p1335_p11 = scmp.lt.u32.totalorder %s1616_s18, %s1943_s1 }
  0x1e   : > { %p1330_p7 = scmp.ne.s32.totalorder %s1616_s18, %s1329_s22  ;;  %p1336_p12 = scmp.lt.u32.totalorder %s1334_s16, %s1329_s22 }
  0x1f   : > { %p1338_p0 = scmp.lt.u32.totalorder %s1329_s22, %s1616_s18 }
  0x20   : > { %p1332_p9 = pnand %p1627_p8, %p1330_p7  ;;  %p1337_p13 = por %p1336_p12, %p1335_p11 }
  0x22   : > { %p1333_p10 = pneg %p1332_p9  ;;  %p1339_p1 = por %p1338_p0, %p1337_p13 }
  0x24   : > { %p1340_p2 = pnand %p1339_p1, %p1333_p10 }
  0x26   : > { %1343 = shalt.err (!%p1340_p2)
}
  0x27   : > { %s1344_s15 = scalar_lea.vmem %s1619_s20, 256  ;;  %s1507_s8 = smov [#allocation4]  }
  0x28   : > { %p1345_p3 = scmp.ne.s32.totalorder %s1619_s20, %s1344_s15  ;;  %s1349_s9 = sshll.u32 %s1507_s8, 4  ;;  %s1350_s9 = int_to_ptr.vmem [resolvable:$false] %s1349_s9 }
  0x29   : > { %s1351_s17 = scalar_lea.vmem %s1350_s9, 512  ;;  %p1352_p7 = scmp.lt.s32.totalorder %s1619_s20, %s1350_s9 }
  0x2a   : > { %p1347_p4 = pnand %p1345_p3, %p1627_p8  ;;  %p1353_p9 = scmp.lt.s32.totalorder %s1351_s17, %s1344_s15 }
  0x2c   : > { %p1348_p5 = pneg %p1347_p4  ;;  %p1354_p11 = por %p1353_p9, %p1352_p7 }
  0x2e   : > { %p1355_p12 = pnand %p1354_p11, %p1348_p5 }
  0x30   : > { %1358 = shalt.err (!%p1355_p12)
}
  0x31   : > { %s1922_s22 = smov 128   ;;  %s1924_s16 = smov 8  }
  0x32   : > { %1268 = dma.hbm_to_vmem [thread:$0]  (!%p1607_p6), %s1616_s18, 256, %s1619_s20, %s1621_s21, %s1922_s22, %s1922_s22, %s1924_s16  }
  0x33   : > { %s1920_s19 = sadd.s32 4294967295, %s1505_s29   ;;  %p59_p10 = scmp.ne.s32.totalorder %s1489_s25, %s1485_s24 }
  0x34   : > { %p1659_p13 = scmp.eq.s32.totalorder %s1920_s19, 0  ;;  %p1113_p0 = scmp.ge.s32.totalorder %s1505_s29, 1 }
  0x35   : > { %p252_p1 = scmp.lt.s32.totalorder %s1505_s29, 3  ;;  %s1510_s24 = smov [#allocation7]  }
  0x36   : > { %s1945_s15 = scalar_select %p1659_p13, 1, 0 }
  0x37   : > { %p1667_p2 = por %p1659_p13, %p59_p10  ;;  %p1671_p3 = pnand %p1113_p0, %p252_p1 }
  0x38   : > { %s264_s18 = sshll.u32 %s1510_s24, 4  ;;  %s1681_s19 = scalar_lea.hbm %s1912_s0, %s1598_s11  ;;  %s265_s18 = int_to_ptr.vmem [resolvable:$true] %s264_s18 }
  0x39   : > { %s1946_s8 = scalar_select %p1667_p2, 1, 0 }
  0x3a   : > { %s1947_s9 = scalar_select %p1671_p3, 1, 0 }
  0x3b   : > { %p1258_p4 = pneg %p1671_p3  ;;  %s285_s22 = scalar_lea.vmem [#allocation2], %s1605_s13 }
  0x3c   : > { %s294_s16 = sshll.u32 %s285_s22, 4  ;;  %s1696_s30 = scalar_lea.hbm %s1914_s2, %s1598_s11  ;;  %s1690_s16 = int_to_ptr.vmem [resolvable:$true] %s294_s16 }
  0x3d   : > { %p1685_p5 = pnand %p1258_p4, %p1659_p13  ;;  %s1359_s20 = scalar_lea.hbm %s1915_s3, 1536 }
  0x3e   : > { %p1360_p7 = scmp.ne.s32.totalorder %s1915_s3, %s1359_s20  ;;  %p1366_p10 = scmp.lt.u32.totalorder %s1359_s20, %s1915_s3 }
  0x3f   : > { %p1361_p9 = pneg %p1685_p5 }
  0x41   : > { %p1362_p11 = pnand %p1361_p9, %p1360_p7 }
  0x43   : > { %p1363_p12 = pneg %p1362_p11 }
  0x45   : > { %p1368_p0 = pnand %p1366_p10, %p1363_p12 }
  0x47   : > { %1371 = shalt.err (!%p1368_p0)
}
  0x48   : > { %s1372_s1 = scalar_lea.vmem %s265_s18, 1536  ;;  %p1380_p2 = scmp.lt.s32.totalorder %s265_s18, %s265_s18 }
  0x49   : > { %p1373_p1 = scmp.ne.s32.totalorder %s265_s18, %s1372_s1  ;;  %p1381_p3 = scmp.lt.s32.totalorder %s1372_s1, %s1372_s1 }
  0x4b   : > { %p1375_p4 = pnand %p1373_p1, %p1361_p9  ;;  %p1382_p6 = por %p1381_p3, %p1380_p2 }
  0x4d   : > { %p1376_p13 = pneg %p1375_p4 }
  0x4f   : > { %p1383_p8 = pnand %p1382_p6, %p1376_p13 }
  0x51   : > { %1386 = shalt.err (!%p1383_p8)
}
  0x52   : > { %s1949_s7 = smov 8   ;;  %s1950_s28 = smov 128  }
  0x53   : > { %1261 = dma.hbm_to_vmem [thread:$0]  (!%p1685_p5), %s1915_s3, 1536, %s265_s18, [#allocation8], %s1950_s28, %s1950_s28, %s1949_s7  }
  0x54   : > { %s1951_s6 = sand.u32 1, %s1493_s26   ;;  %s1387_s20 = scalar_lea.hbm %s1681_s19, 256 }
  0x55   : > { %s1719_s24 = scalar_lea.sflag [#allocation3], %s1951_s6  ;;  %p1388_p6 = scmp.ne.s32.totalorder %s1681_s19, %s1387_s20 }
  0x56   : > { %p1952_p8 = scmp.ne.s32.totalorder %s1944_s23, 0  ;;  %s1392_s22 = scalar_lea.hbm %s1912_s0, 512 }
  0x57   : > { %p1393_p3 = scmp.lt.u32.totalorder %s1681_s19, %s1912_s0  ;;  %p1394_p7 = scmp.lt.u32.totalorder %s1392_s22, %s1387_s20 }
  0x58   : > { %p1390_p13 = pnand %p1388_p6, %p1952_p8  ;;  %p1396_p11 = scmp.lt.u32.totalorder %s1387_s20, %s1681_s19 }
  0x59   : > { %p1395_p9 = por %p1394_p7, %p1393_p3 }
  0x5a   : > { %p1391_p2 = pneg %p1390_p13 }
  0x5b   : > { %p1397_p5 = por %p1396_p11, %p1395_p9 }
  0x5d   : > { %p1398_p12 = pnand %p1397_p5, %p1391_p2 }
  0x5f   : > { %1401 = shalt.err (!%p1398_p12)
}
  0x60   : > { %s1402_s18 = scalar_lea.vmem %s1690_s16, 256  ;;  %s1511_s12 = smov [#allocation2]  }
  0x61   : > { %p1403_p10 = scmp.ne.s32.totalorder %s1690_s16, %s1402_s18  ;;  %s1407_s6 = sshll.u32 %s1511_s12, 4  ;;  %s1408_s6 = int_to_ptr.vmem [resolvable:$false] %s1407_s6 }
  0x62   : > { %s1409_s10 = scalar_lea.vmem %s1408_s6, 512  ;;  %p1410_p4 = scmp.lt.s32.totalorder %s1690_s16, %s1408_s6 }
  0x63   : > { %p1405_p0 = pnand %p1403_p10, %p1952_p8  ;;  %p1411_p6 = scmp.lt.s32.totalorder %s1409_s10, %s1402_s18 }
  0x65   : > { %p1406_p1 = pneg %p1405_p0  ;;  %p1412_p13 = por %p1411_p6, %p1410_p4 }
  0x67   : > { %p1413_p3 = pnand %p1412_p13, %p1406_p1 }
  0x69   : > { %1416 = shalt.err (!%p1413_p3)
}
  0x6a   : > { %p1953_p2 = scmp.ne.s32.totalorder %s1942_s14, 0  ;;  %s331_s20 = scalar_lea.vmem [#allocation6], %s1605_s13 }
  0x6b   : > { %s340_s17 = sshll.u32 %s331_s20, 4  ;;  %s1417_s22 = scalar_lea.hbm %s1696_s30, 256  ;;  %s1747_s17 = int_to_ptr.vmem [resolvable:$true] %s340_s17 }
  0x6c   : > { %1265 = dma.hbm_to_vmem [thread:$0]  (!%p1953_p2), %s1681_s19, 256, %s1690_s16, %s1719_s24, %s1950_s28, %s1950_s28, %s1949_s7  }
  0x6d   : > { %p1418_p7 = scmp.ne.s32.totalorder %s1696_s30, %s1417_s22  ;;  %s1422_s18 = scalar_lea.hbm %s1914_s2, 512 }
  0x6e   : > { %p1423_p5 = scmp.lt.u32.totalorder %s1696_s30, %s1914_s2  ;;  %p1424_p12 = scmp.lt.u32.totalorder %s1422_s18, %s1417_s22 }
  0x6f   : > { %p1420_p9 = pnand %p1418_p7, %p1952_p8  ;;  %p1426_p0 = scmp.lt.u32.totalorder %s1417_s22, %s1696_s30 }
  0x70   : > { %p1425_p10 = por %p1424_p12, %p1423_p5 }
  0x71   : > { %p1421_p11 = pneg %p1420_p9 }
  0x72   : > { %p1427_p1 = por %p1426_p0, %p1425_p10 }
  0x74   : > { %p1428_p4 = pnand %p1427_p1, %p1421_p11 }
  0x76   : > { %1431 = shalt.err (!%p1428_p4)
}
  0x77   : > { %s1432_s13 = scalar_lea.vmem %s1747_s17, 256  ;;  %s1512_s16 = smov [#allocation6]  }
  0x78   : > { %p1433_p6 = scmp.ne.s32.totalorder %s1747_s17, %s1432_s13  ;;  %s1437_s19 = sshll.u32 %s1512_s16, 4  ;;  %s1438_s19 = int_to_ptr.vmem [resolvable:$false] %s1437_s19 }
  0x79   : > { %s1439_s24 = scalar_lea.vmem %s1438_s19, 512  ;;  %p1440_p7 = scmp.lt.s32.totalorder %s1747_s17, %s1438_s19 }
  0x7a   : > { %p1435_p13 = pnand %p1433_p6, %p1952_p8  ;;  %p1441_p9 = scmp.lt.s32.totalorder %s1439_s24, %s1432_s13 }
  0x7c   : > { %p1436_p3 = pneg %p1435_p13  ;;  %p1442_p5 = por %p1441_p9, %p1440_p7 }
  0x7e   : > { %p1443_p12 = pnand %p1442_p5, %p1436_p3 }
  0x80   : > { %1446 = shalt.err (!%p1443_p12)
}
  0x81   : > { %1271 = dma.hbm_to_vmem [thread:$0]  (!%p1953_p2), %s1696_s30, 256, %s1747_s17, %s1621_s21, %s1950_s28, %s1950_s28, %s1949_s7  }
  0x82   : > { %p1954_p8 = scmp.ne.s32.totalorder %s1947_s9, 0 }
  0x83   : > { %s354_s23 = sand.u32 (!%p1954_p8), 1, %s1489_s25   ;;  %p1955_p11 = scmp.ne.s32.totalorder (!%p1954_p8), %s1946_s8, 0 }
  0x84   : > { %352 = sbr.rel (%p1954_p8) target bundleno = 520 (0x208), region = 40  ;;  %s1777_s10 = sshll.u32 (!%p1954_p8), %s354_s23, 4 }
  0x85   : > { %s355_s20 = scalar_lea.sflag (!%p1954_p8), [#allocation3], %s354_s23  ;;  %s358_s22 = scalar_lea.vmem (!%p1954_p8), [#allocation2], %s1777_s10 }
  0x8b   : > { %1472 = dma.done.wait (%p1955_p11), %s355_s20, 256  }
  0x8c   : > { %1474 = vsyncadd (%p1955_p11), %s355_s20, 4294967040  ;;  %s1956_s14 = sadd.s32 4294967295, %s1505_s29   ;;  %s367_s9 = scalar_lea.vmem [#allocation4], %s1777_s10 }
  0x8d   : > { %s363_s30 = sand.u32 1, %s1956_s14  }
  0x8e   : > { %s364_s21 = scalar_lea.sflag [#allocation5], %s363_s30 }
  0x8f   : > { %1476 = dma.done.wait (%p1955_p11), %s364_s21, 512  }
  0x90   : > { %1478 = vsyncadd (%p1955_p11), %s364_s21, 4294966784  ;;  %s376_s7 = scalar_lea.vmem [#allocation6], %s1777_s10  ;;  %p1957_p2 = scmp.ne.s32.totalorder %s1945_s15, 0 }
  0x92   : > { %1480 = dma.done.wait (%p1957_p2), [#allocation8], 1536  }
  0x93   : > { %1482 = vsyncadd (%p1957_p2), [#allocation8], 4294965760  ;;  %vm493_vm0 = vcmask 261120   ;;  %v482_v0 = vld [vmem:[#allocation7] sm:$0xff]  ;;  %v483_v1 = vld [vmem:[#allocation7 + $0x8] sm:$0xff]  ;;  %p447_p10 = scmp.lt.s32.totalorder %s1497_s27, 1 }
  0x94   : > { %v484_v2 = vld [vmem:[#allocation7 + $0x10] sm:$0xff]  ;;  %v1224_v3 = vpack.c.bf16 %v483_v1, %v482_v0  ;;  %v485_v4 = vld [vmem:[#allocation7 + $0x18] sm:$0xff]  ;;  %v608_v6 = vld [vmem:[#allocation7 + $0x20] sm:$0xff]  ;;  %vm575_vm1 = vcmask 64512   ;;  %s1958_s13 = sld [smem:[#allocation16_spill]]  ;;  %s1513_s19 = smov 112  }
  0x95   : > { %v476_v5 = vld [vmem:[%s358_s22] sm:$0xff]  ;;  %v1228_v7 = vpack.c.bf16 %v485_v4, %v484_v2  ;;  %v609_v8 = vld [vmem:[#allocation7 + $0x28] sm:$0xff]  ;;  %v611_v11 = vld [vmem:[#allocation7 + $0x38] sm:$0xff]  ;;  %s1969_s27 = smov (!%p447_p10, %s1497_s27), 1  ;;  %s1514_s24 = smov 120  }
  0x96   : > { %1199 = vmatprep.mubr.msk.f32.mxu0 %vm493_vm0, %v476_v5  ;;  %v610_v9 = vld [vmem:[#allocation7 + $0x30] sm:$0xff]  ;;  %1225 = vmatprep.subr.bf16.mxu0 %v1224_v3  ;;  %v1232_v10 = vpack.c.bf16 %v609_v8, %v608_v6  ;;  %v733_v14 = vld [vmem:[#allocation7 + $0x40] sm:$0xff]  ;;  %v734_v15 = vld [vmem:[#allocation7 + $0x48] sm:$0xff]  ;;  %s1170_s15 = sshll.u32 %s1969_s27, 6  ;;  %s1515_s20 = smov 104  }
  0x97   : > { %v478_v12 = vld [vmem:[%s367_s9] sm:$0xff]  ;;  %1227 = vmatpush3.bf16.msra.mxu0 %v1224_v3  ;;  %v1236_v13 = vpack.c.bf16 %v611_v11, %v610_v9  ;;  %v1240_v16 = vpack.c.bf16 %v734_v15, %v733_v14  ;;  %v736_v18 = vld [vmem:[#allocation7 + $0x58] sm:$0xff]  ;;  %s1822_s11 = scalar_lea.vmem %s1917_s5, %s1170_s15  ;;  %s1959_s30 = sld [smem:[#allocation17_spill]] }
  0x98   : > { %1210 = vmatprep.mubr.msk.f32.mxu1 %vm493_vm0, %v478_v12  ;;  %1229 = vmatprep.subr.bf16.mxu0 %v1228_v7  ;;  %v735_v17 = vld [vmem:[#allocation7 + $0x50] sm:$0xff]  ;;  %v477_v19 = vld [vmem:[%s358_s22 + $0x8] sm:$0xff]  ;;  %v1136_v24 = vld [vmem:[%s1916_s4] ss:$0 sm:$0xff] }
  0x99   : > { %1233 = vmatprep.subr.bf16.mxu1 %v1232_v10  ;;  %v1244_v20 = vpack.c.bf16 %v736_v18, %v735_v17  ;;  %v480_v21 = vld [vmem:[%s376_s7] sm:$0xff]  ;;  %v479_v22 = vld [vmem:[%s367_s9 + $0x8] sm:$0xff] }
  0x9a   : > { %1235 = vmatpush3.bf16.msra.mxu1 %v1232_v10  ;;  %v481_v23 = vld [vmem:[%s376_s7 + $0x8] sm:$0xff]  ;;  %v1146_v26 = vld [vmem:[%s1916_s4 + $0x1] ss:$0 sm:$0xff]  ;;  %s1830_s16 = scalar_lea.vmem %s1958_s13, %s1170_s15  ;;  %v1156_v34 = vld [vmem:[%s1916_s4 + $0x2] ss:$0 sm:$0xff] }
  0x9b   : > { %1237 = vmatprep.subr.bf16.mxu1 %v1236_v13  ;;  %1231 = vmatpush3.bf16.msra.mxu0 %v1228_v7 }
  0x9c   : > { %1241 = vmatprep.subr.bf16.mxu0 %v1240_v16 }
  0x9d   : > { %s1847_s21 = scalar_lea.vmem %s1959_s30, %s1170_s15 }
  0x9e   : > { %1239 = vmatpush3.bf16.msra.mxu1 %v1236_v13  ;;  %1200 = vmatmul.mubr.msk.f32.vlgmr.msra.gmra.mrb[0].mxu0 %vm493_vm0, %v477_v19 }
  0x9f   : > { %1243 = vmatpush3.bf16.msra.mxu0 %v1240_v16  ;;  %1221 = vmatprep.mubr.msk.f32.mxu0 %vm493_vm0, %v480_v21 }
  0xa0   : > { %1245 = vmatprep.subr.bf16.mxu0 %v1244_v20 }
  0xa1   : > { %1211 = vmatmul.mubr.msk.f32.vlgmr.msra.gmra.mrb[0].mxu1 %vm493_vm0, %v479_v22 }
  0xa3   : > { %1247 = vmatpush3.bf16.msra.mxu0 %v1244_v20 }
  0xa6   : > { %1222 = vmatmul.mubr.msk.f32.vlgmr.msra.gmra.mrb[2].mxu0 %vm493_vm0, %v481_v23 }
 0x171   : > { %v1201_v25 = vpop.f32.mrb[0].mxu0 }
 0x172   : > { %v572_v27 = vadd.f32 %v1201_v25, %v1136_v24  ;;  %v566_v28 = vpop.f32.mrb[1].mxu0 }
 0x173   : > { %v567_v29 = vadd.f32 %v1136_v24, %v566_v28 }
 0x174   : > { %v1212_v30 = vpop.f32.mrb[0].mxu1  ;;  %577 = vst.msk [vmem:[%s1822_s11 + $0x8] sm:$0xff] %vm575_vm1, %v572_v27  ;;  %591 = vrot.lane.b32.xlu1 %v572_v27, %s1513_s19  ;;  %582 = vrot.lane.b32.xlu0 %v572_v27, %s1514_s24 }
 0x175   : > { %v698_v31 = vadd.f32 %v1212_v30, %v1146_v26  ;;  %v692_v32 = vpop.f32.mrb[1].mxu1  ;;  %576 = vst.msk [vmem:[%s1822_s11] sm:$0xff] %vm575_vm1, %v567_v29 }
 0x176   : > { %v693_v33 = vadd.f32 %v1146_v26, %v692_v32 }
 0x177   : > { %702 = vst.msk [vmem:[%s1830_s16 + $0x8] sm:$0xff] %vm575_vm1, %v698_v31 }
 0x178   : > { %701 = vst.msk [vmem:[%s1830_s16] sm:$0xff] %vm575_vm1, %v693_v33  ;;  %600 = vrot.lane.b32.xlu1 %v572_v27, %s1515_s20  ;;  %580 = vrot.lane.b32.xlu0 %v567_v29, %s1514_s24 }
 0x179   : > { %v1223_v35 = vpop.f32.mrb[2].mxu0 }
 0x17a   : > { %v823_v36 = vadd.f32 %v1223_v35, %v1156_v34  ;;  %v817_v37 = vpop.f32.mrb[3].mxu0 }
 0x17b   : > { %v818_v38 = vadd.f32 %v1156_v34, %v817_v37 }
 0x17c   : > { %707 = vrot.lane.b32.xlu1 %v698_v31, %s1514_s24  ;;  %598 = vrot.lane.b32.xlu0 %v567_v29, %s1515_s20  ;;  %827 = vst.msk [vmem:[%s1847_s21 + $0x8] sm:$0xff] %vm575_vm1, %v823_v36 }
 0x17d   : > { %826 = vst.msk [vmem:[%s1847_s21] sm:$0xff] %vm575_vm1, %v818_v38 }
 0x180   : > { %716 = vrot.lane.b32.xlu1 %v698_v31, %s1513_s19  ;;  %705 = vrot.lane.b32.xlu0 %v693_v33, %s1514_s24 }
 0x184   : > { %725 = vrot.lane.b32.xlu1 %v698_v31, %s1515_s20  ;;  %714 = vrot.lane.b32.xlu0 %v693_v33, %s1513_s19 }
 0x188   : > { %589 = vrot.lane.b32.xlu1 %v567_v29, %s1513_s19  ;;  %723 = vrot.lane.b32.xlu0 %v693_v33, %s1515_s20 }
 0x18c   : > { %832 = vrot.lane.b32.xlu1 %v823_v36, %s1514_s24  ;;  %830 = vrot.lane.b32.xlu0 %v818_v38, %s1514_s24 }
 0x190   : > { %841 = vrot.lane.b32.xlu1 %v823_v36, %s1513_s19  ;;  %839 = vrot.lane.b32.xlu0 %v818_v38, %s1513_s19 }
 0x194   : > { %850 = vrot.lane.b32.xlu1 %v823_v36, %s1515_s20  ;;  %848 = vrot.lane.b32.xlu0 %v818_v38, %s1515_s20 }
 0x1e6   : > { %v592_v39 = vpop.permute.xlu1 %591  ;;  %v583_v40 = vpop.permute.xlu0 %582 }
 0x1e7   : > { %1142 = vst.msk [vmem:[%s1822_s11 + $0x28] sm:$0xff] %vm575_vm1, %v592_v39  ;;  %1140 = vst.msk [vmem:[%s1822_s11 + $0x18] sm:$0xff] %vm575_vm1, %v583_v40 }
 0x1ea   : > { %v601_v41 = vpop.permute.xlu1 %600  ;;  %v581_v42 = vpop.permute.xlu0 %580 }
 0x1eb   : > { %1144 = vst.msk [vmem:[%s1822_s11 + $0x38] sm:$0xff] %vm575_vm1, %v601_v41  ;;  %1139 = vst.msk [vmem:[%s1822_s11 + $0x10] sm:$0xff] %vm575_vm1, %v581_v42 }
 0x1ee   : > { %v708_v43 = vpop.permute.xlu1 %707  ;;  %v599_v44 = vpop.permute.xlu0 %598 }
 0x1ef   : > { %1150 = vst.msk [vmem:[%s1830_s16 + $0x18] sm:$0xff] %vm575_vm1, %v708_v43  ;;  %1143 = vst.msk [vmem:[%s1822_s11 + $0x30] sm:$0xff] %vm575_vm1, %v599_v44 }
 0x1f2   : > { %v717_v45 = vpop.permute.xlu1 %716  ;;  %v706_v46 = vpop.permute.xlu0 %705 }
 0x1f3   : > { %1152 = vst.msk [vmem:[%s1830_s16 + $0x28] sm:$0xff] %vm575_vm1, %v717_v45  ;;  %1149 = vst.msk [vmem:[%s1830_s16 + $0x10] sm:$0xff] %vm575_vm1, %v706_v46 }
 0x1f6   : > { %v726_v47 = vpop.permute.xlu1 %725  ;;  %v715_v48 = vpop.permute.xlu0 %714 }
 0x1f7   : > { %1154 = vst.msk [vmem:[%s1830_s16 + $0x38] sm:$0xff] %vm575_vm1, %v726_v47  ;;  %1151 = vst.msk [vmem:[%s1830_s16 + $0x20] sm:$0xff] %vm575_vm1, %v715_v48 }
 0x1fa   : > { %v590_v49 = vpop.permute.xlu1 %589  ;;  %v724_v50 = vpop.permute.xlu0 %723 }
 0x1fb   : > { %1141 = vst.msk [vmem:[%s1822_s11 + $0x20] sm:$0xff] %vm575_vm1, %v590_v49  ;;  %1153 = vst.msk [vmem:[%s1830_s16 + $0x30] sm:$0xff] %vm575_vm1, %v724_v50 }
 0x1fe   : > { %v833_v51 = vpop.permute.xlu1 %832  ;;  %v831_v52 = vpop.permute.xlu0 %830 }
 0x1ff   : > { %1160 = vst.msk [vmem:[%s1847_s21 + $0x18] sm:$0xff] %vm575_vm1, %v833_v51  ;;  %1159 = vst.msk [vmem:[%s1847_s21 + $0x10] sm:$0xff] %vm575_vm1, %v831_v52 }
 0x202   : > { %v842_v53 = vpop.permute.xlu1 %841  ;;  %v840_v54 = vpop.permute.xlu0 %839 }
 0x203   : > { %1162 = vst.msk [vmem:[%s1847_s21 + $0x28] sm:$0xff] %vm575_vm1, %v842_v53  ;;  %1161 = vst.msk [vmem:[%s1847_s21 + $0x20] sm:$0xff] %vm575_vm1, %v840_v54 }
 0x206   : > { %v851_v55 = vpop.permute.xlu1 %850  ;;  %v849_v56 = vpop.permute.xlu0 %848 }
 0x207   : > { %1164 = vst.msk [vmem:[%s1847_s21 + $0x38] sm:$0xff] %vm575_vm1, %v851_v55  ;;  %1163 = vst.msk [vmem:[%s1847_s21 + $0x30] sm:$0xff] %vm575_vm1, %v849_v56 }
 0x208 PF: > { %s25_s29 = sadd.s32 1, %s1505_s29   ;;  %s1960_s9 = sld [smem:[#allocation14_spill]] }
 0x209   : > { %p22_p0 = scmp.ge.s32.totalorder %s25_s29, 4   ;;  %s1961_s27 = sld [smem:[#allocation12_spill]] }
 0x20a   : > { %s1962_s28 = sld [smem:[#allocation13_spill]]  ;;  %s1963_s24 = smov %s1489_s25 }
 0x20b   : > { %s1964_s25 = smov %s1493_s26  ;;  %24 = sbr.rel (!%p22_p0) target bundleno = 11 (0xb), region = 145 }
 0x20e   : > { %s1965_s26 = smov %s1960_s9 }
 0x212   :  { %937 = vsyncpa [#allocation3], 1 }
 0x213   :  { %939 = vsyncpa [#allocation3 + $0x1], 1 }
 0x214   :  { %940 = vsyncpa [#allocation5], 1 }
 0x215   :  { %942 = vsyncpa [#allocation5 + $0x1], 1 }
 0x216   :  { %943 = vsyncpa [#allocation8], 1 }

</bundles_post_ra>
